<compile_context>
chip_gen: v7x
topology: tpu7x:2x2x1
jax: 0.10.0
libtpu: 0.0.40
codegen_flags: <defaults>
</compile_context>

<pallas_src>
import functools
import math

import jax
import jax.numpy as jnp
from jax import lax
from jax.experimental import pallas as pl
from jax.experimental.pallas import tpu as pltpu


def _mlp_block_kernel(x_ref, gamma_ref, beta_ref, w1_ref, b1_ref, w2_ref, b2_ref,
                      o_ref, *, eps, approx_gelu):
    # Grid: (row_tiles,).  Weights / biases / LN params have constant index
    # maps, so they are DMA'd once and stay VMEM-resident across row tiles.

    # --- LayerNorm over the embedding axis (f32 math) ---
    x = x_ref[...].astype(jnp.float32)
    mean = jnp.mean(x, axis=-1, keepdims=True)
    centered = x - mean
    var = jnp.mean(centered * centered, axis=-1, keepdims=True)
    xn = centered * lax.rsqrt(var + eps)
    xn = xn * gamma_ref[...].astype(jnp.float32) + beta_ref[...].astype(jnp.float32)

    # --- Linear(E -> H) on the MXU: bf16 x bf16 -> f32 accumulate ---
    h = jnp.dot(xn.astype(jnp.bfloat16), w1_ref[...],
                preferred_element_type=jnp.float32)
    h = h + b1_ref[...].astype(jnp.float32)

    # --- GELU ---
    if approx_gelu:
        # tanh approximation: jnp.tanh issues to the EUP slot and co-issues
        # with the MXU on v6e/v7x (use only when approximate GELU is OK).
        c = math.sqrt(2.0 / math.pi)
        h = 0.5 * h * (1.0 + jnp.tanh(c * (h + 0.044715 * h * h * h)))
    else:
        # Exact erf-based GELU (torch.nn.GELU default), f32 math.
        h = 0.5 * h * (1.0 + lax.erf(h * (1.0 / math.sqrt(2.0))))

    # (Dropout: identity at inference.)

    # --- Linear(H -> E): single full-K dot straight into the output block ---
    out = jnp.dot(h.astype(jnp.bfloat16), w2_ref[...],
                  preferred_element_type=jnp.float32)
    out = out + b2_ref[...].astype(jnp.float32)

    # (Dropout: identity at inference.)
    o_ref[...] = out.astype(o_ref.dtype)


def mlp_block(x, gamma, beta, w1, b1, w2, b2, *, eps=1e-5, row_tile=512,
              approx_gelu=False, vmem_limit_bytes=48 * 1024 * 1024):
    """x: [B, S, E]. Linear weights follow PyTorch parameter values but are
    stored pre-transposed as (E, H) / (H, E); they are cast to bf16 for the
    MXU (f32 accumulation)."""
    B, S, E = x.shape
    H = w1.shape[1]
    tokens = B * S

    # Row tile: large for real workloads, clamped (to a multiple of 8 sublanes)
    # for tiny inputs so we don't pad 16 tokens up to 512 rows.
    tm = min(row_tile, pl.cdiv(tokens, 8) * 8)

    # Pad the token dimension to a multiple of the row tile (zero rows are
    # numerically safe through LayerNorm thanks to eps, and sliced off below).
    padded = pl.cdiv(tokens, tm) * tm
    x2d = x.reshape(tokens, E)
    if padded != tokens:
        x2d = jnp.pad(x2d, ((0, padded - tokens), (0, 0)))

    gamma2d = gamma.reshape(1, E)
    beta2d = beta.reshape(1, E)
    b1_2d = b1.reshape(1, H)
    b2_2d = b2.reshape(1, E)
    w1_bf = w1.astype(jnp.bfloat16)
    w2_bf = w2.astype(jnp.bfloat16)

    grid = (padded // tm,)

    out2d = pl.pallas_call(
        functools.partial(_mlp_block_kernel, eps=eps, approx_gelu=approx_gelu),
        out_shape=jax.ShapeDtypeStruct((padded, E), x.dtype),
        grid_spec=pltpu.PrefetchScalarGridSpec(
            num_scalar_prefetch=0,
            grid=grid,
            in_specs=[
                pl.BlockSpec((tm, E), lambda i: (i, 0)),   # x tile (streamed per row tile)
                pl.BlockSpec((1, E), lambda i: (0, 0)),    # gamma    (resident)
                pl.BlockSpec((1, E), lambda i: (0, 0)),    # beta     (resident)
                pl.BlockSpec((E, H), lambda i: (0, 0)),    # W1, bf16 (resident)
                pl.BlockSpec((1, H), lambda i: (0, 0)),    # b1       (resident)
                pl.BlockSpec((H, E), lambda i: (0, 0)),    # W2, bf16 (resident)
                pl.BlockSpec((1, E), lambda i: (0, 0)),    # b2       (resident)
            ],
            out_specs=pl.BlockSpec((tm, E), lambda i: (i, 0)),
        ),
        compiler_params=pltpu.CompilerParams(
            dimension_semantics=("parallel",),
            vmem_limit_bytes=vmem_limit_bytes),
    )(x2d, gamma2d, beta2d, w1_bf, b1_2d, w2_bf, b2_2d)

    return out2d[:tokens].reshape(B, S, E)


def reference_mlp_block(x, gamma, beta, w1, b1, w2, b2, eps=1e-5):
    # Same numerics as the kernel: f32 LayerNorm, bf16 MXU inputs, f32 accum,
    # exact erf GELU.
    mean = jnp.mean(x, axis=-1, keepdims=True)
    var = jnp.mean((x - mean) ** 2, axis=-1, keepdims=True)
    xn = (x - mean) * lax.rsqrt(var + eps) * gamma + beta
    h = jnp.dot(xn.astype(jnp.bfloat16), w1.astype(jnp.bfloat16),
                preferred_element_type=jnp.float32) + b1
    h = 0.5 * h * (1.0 + lax.erf(h / math.sqrt(2.0)))
    out = jnp.dot(h.astype(jnp.bfloat16), w2.astype(jnp.bfloat16),
                  preferred_element_type=jnp.float32) + b2
    return out


if __name__ == "__main__":
    # Small shapes consistent with the module (embedding_dim, hidden_size),
    # chosen TPU-friendly: E=128, H=256, batch=2, seq=8.
    B, S, E, H = 2, 8, 128, 256

    key = jax.random.PRNGKey(0)
    kx, kg, kb, kw1, kb1, kw2, kb2 = jax.random.split(key, 7)

    x = jax.random.normal(kx, (B, S, E), dtype=jnp.float32)

    # LayerNorm params (PyTorch init: weight=1, bias=0; perturbed so the
    # affine path is exercised).
    gamma = jnp.ones((E,), jnp.float32) + 0.01 * jax.random.normal(kg, (E,), jnp.float32)
    beta = 0.01 * jax.random.normal(kb, (E,), jnp.float32)

    # Linear params, stored pre-transposed as (in, out) for the kernel.
    w1 = jax.random.normal(kw1, (E, H), dtype=jnp.float32) * (1.0 / math.sqrt(E))
    b1 = jax.random.normal(kb1, (H,), dtype=jnp.float32) * 0.02
    w2 = jax.random.normal(kw2, (H, E), dtype=jnp.float32) * (1.0 / math.sqrt(H))
    b2 = jax.random.normal(kb2, (E,), dtype=jnp.float32) * 0.02

    out = mlp_block(x, gamma, beta, w1, b1, w2, b2)
    out = jax.block_until_ready(out)

    ref = reference_mlp_block(x, gamma, beta, w1, b1, w2, b2)
    assert out.shape == (B, S, E)
    assert jnp.allclose(out, ref, atol=1e-2, rtol=1e-2), "mismatch vs reference"

    print("KERNEL_OK")
</pallas_src>

<mosaic_0001>
module attributes {stable_mosaic.version = 11 : i64} {
  func.func @_mlp_block_kernel(%arg0: i32, %arg1: memref<16x128xf32, #tpu.memory_space<vmem>>, %arg2: memref<1x128xf32, #tpu.memory_space<vmem>>, %arg3: memref<1x128xf32, #tpu.memory_space<vmem>>, %arg4: memref<128x256xbf16, #tpu.memory_space<vmem>>, %arg5: memref<1x256xf32, #tpu.memory_space<vmem>>, %arg6: memref<256x128xbf16, #tpu.memory_space<vmem>>, %arg7: memref<1x128xf32, #tpu.memory_space<vmem>>, %arg8: memref<16x128xf32, #tpu.memory_space<vmem>>) attributes {dimension_semantics = [#tpu.dimension_semantics<parallel>], iteration_bounds = array<i64: 1>, scalar_prefetch = 0 : i64, scratch_operands = 0 : i64, tpu.core_type = #tpu.core_type<tc>, window_params = [{transform_indices = @transform_0, window_bounds = array<i64: 16, 128>}, {pipeline_mode = #tpu.pipeline_mode<synchronous>, transform_indices = @transform_1, window_bounds = array<i64: 1, 128>}, {pipeline_mode = #tpu.pipeline_mode<synchronous>, transform_indices = @transform_2, window_bounds = array<i64: 1, 128>}, {pipeline_mode = #tpu.pipeline_mode<synchronous>, transform_indices = @transform_3, window_bounds = array<i64: 128, 256>}, {pipeline_mode = #tpu.pipeline_mode<synchronous>, transform_indices = @transform_4, window_bounds = array<i64: 1, 256>}, {pipeline_mode = #tpu.pipeline_mode<synchronous>, transform_indices = @transform_5, window_bounds = array<i64: 256, 128>}, {pipeline_mode = #tpu.pipeline_mode<synchronous>, transform_indices = @transform_6, window_bounds = array<i64: 1, 128>}, {transform_indices = @transform_7, window_bounds = array<i64: 16, 128>}]} {
    %c0 = arith.constant 0 : index
    %c0_0 = arith.constant 0 : index
    %0 = vector.load %arg1[%c0, %c0_0] : memref<16x128xf32, #tpu.memory_space<vmem>>, vector<16x128xf32>
    %cst = arith.constant dense<0.000000e+00> : vector<16xf32>
    %1 = vector.multi_reduction <add>, %0, %cst [1] : vector<16x128xf32> to vector<16xf32>
    %2 = vector.shape_cast %1 : vector<16xf32> to vector<16x1xf32>
    %cst_1 = arith.constant 1.280000e+02 : f32
    %3 = vector.broadcast %cst_1 : f32 to vector<16x1xf32>
    %4 = arith.divf %2, %3 : vector<16x1xf32>
    %5 = vector.broadcast %4 : vector<16x1xf32> to vector<16x128xf32>
    %6 = arith.subf %0, %5 : vector<16x128xf32>
    %7 = arith.mulf %6, %6 : vector<16x128xf32>
    %cst_2 = arith.constant dense<0.000000e+00> : vector<16xf32>
    %8 = vector.multi_reduction <add>, %7, %cst_2 [1] : vector<16x128xf32> to vector<16xf32>
    %9 = vector.shape_cast %8 : vector<16xf32> to vector<16x1xf32>
    %cst_3 = arith.constant 1.280000e+02 : f32
    %10 = vector.broadcast %cst_3 : f32 to vector<16x1xf32>
    %11 = arith.divf %9, %10 : vector<16x1xf32>
    %cst_4 = arith.constant 9.99999974E-6 : f32
    %12 = vector.broadcast %cst_4 : f32 to vector<16x1xf32>
    %13 = arith.addf %11, %12 : vector<16x1xf32>
    %14 = math.rsqrt %13 : vector<16x1xf32>
    %15 = vector.broadcast %14 : vector<16x1xf32> to vector<16x128xf32>
    %16 = arith.mulf %6, %15 : vector<16x128xf32>
    %c0_5 = arith.constant 0 : index
    %c0_6 = arith.constant 0 : index
    %17 = vector.load %arg2[%c0_5, %c0_6] : memref<1x128xf32, #tpu.memory_space<vmem>>, vector<1x128xf32>
    %18 = vector.broadcast %17 : vector<1x128xf32> to vector<16x128xf32>
    %19 = arith.mulf %16, %18 : vector<16x128xf32>
    %c0_7 = arith.constant 0 : index
    %c0_8 = arith.constant 0 : index
    %20 = vector.load %arg3[%c0_7, %c0_8] : memref<1x128xf32, #tpu.memory_space<vmem>>, vector<1x128xf32>
    %21 = vector.broadcast %20 : vector<1x128xf32> to vector<16x128xf32>
    %22 = arith.addf %19, %21 : vector<16x128xf32>
    %23 = arith.truncf %22 : vector<16x128xf32> to vector<16x128xbf16>
    %c0_9 = arith.constant 0 : index
    %c0_10 = arith.constant 0 : index
    %24 = vector.load %arg4[%c0_9, %c0_10] : memref<128x256xbf16, #tpu.memory_space<vmem>>, vector<128x256xbf16>
    %cst_11 = arith.constant dense<0.000000e+00> : vector<16x256xf32>
    %25 = tpu.matmul %23, %24, %cst_11 {dimension_numbers = #tpu.dot_dimension_numbers<[1], [0], [0], [1], [0, 0, 1, 1], [], []>} : vector<16x128xbf16>, vector<128x256xbf16>, vector<16x256xf32> -> vector<16x256xf32>
    %c0_12 = arith.constant 0 : index
    %c0_13 = arith.constant 0 : index
    %26 = vector.load %arg5[%c0_12, %c0_13] : memref<1x256xf32, #tpu.memory_space<vmem>>, vector<1x256xf32>
    %27 = vector.broadcast %26 : vector<1x256xf32> to vector<16x256xf32>
    %28 = arith.addf %25, %27 : vector<16x256xf32>
    %cst_14 = arith.constant 5.000000e-01 : f32
    %29 = vector.broadcast %cst_14 : f32 to vector<16x256xf32>
    %30 = arith.mulf %29, %28 : vector<16x256xf32>
    %cst_15 = arith.constant 0.707106769 : f32
    %31 = vector.broadcast %cst_15 : f32 to vector<16x256xf32>
    %32 = arith.mulf %28, %31 : vector<16x256xf32>
    %33 = math.erf %32 : vector<16x256xf32>
    %cst_16 = arith.constant 1.000000e+00 : f32
    %34 = vector.broadcast %cst_16 : f32 to vector<16x256xf32>
    %35 = arith.addf %34, %33 : vector<16x256xf32>
    %36 = arith.mulf %30, %35 : vector<16x256xf32>
    %37 = arith.truncf %36 : vector<16x256xf32> to vector<16x256xbf16>
    %c0_17 = arith.constant 0 : index
    %c0_18 = arith.constant 0 : index
    %38 = vector.load %arg6[%c0_17, %c0_18] : memref<256x128xbf16, #tpu.memory_space<vmem>>, vector<256x128xbf16>
    %cst_19 = arith.constant dense<0.000000e+00> : vector<16x128xf32>
    %39 = tpu.matmul %37, %38, %cst_19 {dimension_numbers = #tpu.dot_dimension_numbers<[1], [0], [0], [1], [0, 0, 1, 1], [], []>} : vector<16x256xbf16>, vector<256x128xbf16>, vector<16x128xf32> -> vector<16x128xf32>
    %c0_20 = arith.constant 0 : index
    %c0_21 = arith.constant 0 : index
    %40 = vector.load %arg7[%c0_20, %c0_21] : memref<1x128xf32, #tpu.memory_space<vmem>>, vector<1x128xf32>
    %41 = vector.broadcast %40 : vector<1x128xf32> to vector<16x128xf32>
    %42 = arith.addf %39, %41 : vector<16x128xf32>
    %c0_22 = arith.constant 0 : index
    %c0_23 = arith.constant 0 : index
    %43 = vector.load %arg8[%c0_22, %c0_23] : memref<16x128xf32, #tpu.memory_space<vmem>>, vector<16x128xf32>
    tpu.vector_store %arg8[%c0_22, %c0_23], %42 {strides = array<i32>} : memref<16x128xf32, #tpu.memory_space<vmem>>, vector<16x128xf32>,
    return
  }
  func.func @transform_0(%arg0: i32) -> (i32, i32) {
    %c0_i32 = arith.constant 0 : i32
    %c0_i32_0 = arith.constant 0 : i32
    return %arg0, %c0_i32 : i32, i32
  }
  func.func @transform_1(%arg0: i32) -> (i32, i32) {
    %c0_i32 = arith.constant 0 : i32
    %c0_i32_0 = arith.constant 0 : i32
    %c0_i32_1 = arith.constant 0 : i32
    return %c0_i32, %c0_i32_0 : i32, i32
  }
  func.func @transform_2(%arg0: i32) -> (i32, i32) {
    %c0_i32 = arith.constant 0 : i32
    %c0_i32_0 = arith.constant 0 : i32
    %c0_i32_1 = arith.constant 0 : i32
    return %c0_i32, %c0_i32_0 : i32, i32
  }
  func.func @transform_3(%arg0: i32) -> (i32, i32) {
    %c0_i32 = arith.constant 0 : i32
    %c0_i32_0 = arith.constant 0 : i32
    %c0_i32_1 = arith.constant 0 : i32
    return %c0_i32, %c0_i32_0 : i32, i32
  }
  func.func @transform_4(%arg0: i32) -> (i32, i32) {
    %c0_i32 = arith.constant 0 : i32
    %c0_i32_0 = arith.constant 0 : i32
    %c0_i32_1 = arith.constant 0 : i32
    return %c0_i32, %c0_i32_0 : i32, i32
  }
  func.func @transform_5(%arg0: i32) -> (i32, i32) {
    %c0_i32 = arith.constant 0 : i32
    %c0_i32_0 = arith.constant 0 : i32
    %c0_i32_1 = arith.constant 0 : i32
    return %c0_i32, %c0_i32_0 : i32, i32
  }
  func.func @transform_6(%arg0: i32) -> (i32, i32) {
    %c0_i32 = arith.constant 0 : i32
    %c0_i32_0 = arith.constant 0 : i32
    %c0_i32_1 = arith.constant 0 : i32
    return %c0_i32, %c0_i32_0 : i32, i32
  }
  func.func @transform_7(%arg0: i32) -> (i32, i32) {
    %c0_i32 = arith.constant 0 : i32
    %c0_i32_0 = arith.constant 0 : i32
    return %arg0, %c0_i32 : i32, i32
  }
}

</mosaic_0001>

<bundles_post_ra>
// kernel: tpu_custom_call.1
= control target key start
LH: loop header
LB: loop body
LE: loop exit
PB: predicated region body
PF: predicated region fallthrough
CT: control target
= control target key end

     0   :  { %12 = vsyncpa [#allocation3], 0  ;;  %s819_s0 = inlined_call_operand.hbm [shape: f32[16,128], index: 0, kind: input, shape index: {}]   ;;  %s820_s1 = inlined_call_operand.vmem [shape: f32[1,128], index: 1, kind: input, shape index: {}]   ;;  %s821_s2 = inlined_call_operand.vmem [shape: f32[1,128], index: 2, kind: input, shape index: {}]   ;;  %s822_s3 = inlined_call_operand.hbm [shape: bf16[128,256], index: 3, kind: input, shape index: {}]   ;;  %s823_s4 = inlined_call_operand.vmem [shape: f32[1,256], index: 4, kind: input, shape index: {}]   ;;  %s824_s5 = inlined_call_operand.hbm [shape: bf16[256,128], index: 5, kind: input, shape index: {}]   ;;  %s825_s6 = inlined_call_operand.vmem [shape: f32[1,128], index: 6, kind: input, shape index: {}]   ;;  %s826_s7 = inlined_call_operand.hbm [shape: f32[16,128], index: 7, kind: output, shape index: {}]  }
   0x1   :  { %13 = vsyncpa [#allocation6], 0 }
   0x2   :  { %14 = vsyncpa [#allocation4], 0  ;;  %s694_s24 = smov [#allocation5]   ;;  %s695_s26 = smov [#allocation2]  }
   0x3   :  { %s36_s25 = sshll.u32 %s694_s24, 4  ;;  %s20_s27 = sshll.u32 %s695_s26, 4  ;;  %s37_s25 = int_to_ptr.vmem [resolvable:$true] %s36_s25  ;;  %s743_s27 = int_to_ptr.vmem [resolvable:$true] %s20_s27 }
   0x4   :  { %s600_s30 = scalar_lea.hbm %s822_s3, 2048 }
   0x5   :  { %p601_p0 = scmp.ne.s32.totalorder %s822_s3, %s600_s30  ;;  %p604_p1 = scmp.lt.u32.totalorder %s600_s30, %s822_s3 }
   0x7   :  { %p606_p2 = pnand %p604_p1, %p601_p0 }
   0x9   :  { %609 = shalt.err (!%p606_p2)
}
   0xa   :  { %s610_s12 = scalar_lea.vmem %s37_s25, 2048  ;;  %p615_p4 = scmp.lt.s32.totalorder %s37_s25, %s37_s25 }
   0xb   :  { %p611_p3 = scmp.ne.s32.totalorder %s37_s25, %s610_s12  ;;  %p616_p5 = scmp.lt.s32.totalorder %s610_s12, %s610_s12 }
   0xd   :  { %p617_p6 = por %p616_p5, %p615_p4 }
   0xf   :  { %p618_p7 = pnand %p617_p6, %p611_p3 }
  0x11   :  { %621 = shalt.err (!%p618_p7)
}
  0x12   :  { %s696_s13 = smov 128   ;;  %s697_s14 = smov 8  }
  0x13   :  { %42 = dma.hbm_to_vmem [thread:$0]  %s822_s3, 2048, %s37_s25, [#allocation6], %s696_s13, %s696_s13, %s697_s14  }
  0x14   :  { %s622_s19 = scalar_lea.hbm %s819_s0, 256 }
  0x15   :  { %p623_p8 = scmp.ne.s32.totalorder %s819_s0, %s622_s19  ;;  %p626_p9 = scmp.lt.u32.totalorder %s622_s19, %s819_s0 }
  0x17   :  { %p628_p10 = pnand %p626_p9, %p623_p8 }
  0x19   :  { %631 = shalt.err (!%p628_p10)
}
  0x1a   :  { %s632_s24 = scalar_lea.vmem %s743_s27, 256  ;;  %p637_p12 = scmp.lt.s32.totalorder %s743_s27, %s743_s27 }
  0x1b   :  { %p633_p11 = scmp.ne.s32.totalorder %s743_s27, %s632_s24  ;;  %p638_p13 = scmp.lt.s32.totalorder %s632_s24, %s632_s24 }
  0x1d   :  { %p639_p0 = por %p638_p13, %p637_p12 }
  0x1f   :  { %p640_p1 = pnand %p639_p0, %p633_p11 }
  0x21   :  { %643 = shalt.err (!%p640_p1)
}
  0x22   :  { %26 = dma.hbm_to_vmem [thread:$0]  %s819_s0, 256, %s743_s27, [#allocation3], %s696_s13, %s696_s13, %s697_s14  }
  0x23   :  { %s698_s26 = smov [#allocation7]   ;;  %s644_s8 = scalar_lea.hbm %s824_s5, 2048 }
  0x24   :  { %s50_s28 = sshll.u32 %s698_s26, 4  ;;  %p645_p2 = scmp.ne.s32.totalorder %s824_s5, %s644_s8  ;;  %s51_s28 = int_to_ptr.vmem [resolvable:$true] %s50_s28 }
  0x25   :  { %p648_p3 = scmp.lt.u32.totalorder %s644_s8, %s824_s5 }
  0x27   :  { %p650_p4 = pnand %p648_p3, %p645_p2 }
  0x29   :  { %653 = shalt.err (!%p650_p4)
}
  0x2a   :  { %s654_s15 = scalar_lea.vmem %s51_s28, 2048  ;;  %p659_p6 = scmp.lt.s32.totalorder %s51_s28, %s51_s28 }
  0x2b   :  { %p655_p5 = scmp.ne.s32.totalorder %s51_s28, %s654_s15  ;;  %p660_p7 = scmp.lt.s32.totalorder %s654_s15, %s654_s15 }
  0x2d   :  { %p661_p8 = por %p660_p7, %p659_p6 }
  0x2f   :  { %p662_p9 = pnand %p661_p8, %p655_p5 }
  0x31   :  { %665 = shalt.err (!%p662_p9)
}
  0x32   :  { %s699_s0 = smov 64   ;;  %s700_s27 = smov 4  }
  0x33   :  { %56 = dma.hbm_to_vmem [thread:$0]  %s824_s5, 2048, %s51_s28, [#allocation6], %s699_s0, %s699_s0, %s700_s27  }
  0x34   :  { %688 = dma.done.wait [#allocation3], 256  }
  0x35   :  { %689 = vsyncadd [#allocation3], 4294967040 }
  0x36   :  { %690 = dma.done.wait [#allocation6], 4096  }
  0x37   :  { %691 = vsyncadd [#allocation6], 4294963200  ;;  %v69_v0 = vld [vmem:[#allocation2] sm:$0xff]  ;;  %v70_v1 = vld [vmem:[#allocation2 + $0x8] sm:$0xff]  ;;  %v701_v21 = vmov 0   ;;  %v131_v60 = vlaneseq  ;;  %s702_s22 = smov [#allocation8]  }
  0x38   :  { %71 = vadd.xlane.f32.xlu0 %v69_v0  ;;  %v548_v2 = vld [vmem:[#allocation5 + $0x4] ss:$8 sps:$4 sm:$0xff]   ;;  %v550_v3 = vld [vmem:[#allocation5] ss:$8 sps:$4 sm:$0xff]   ;;  %v551_v4 = vld [vmem:[#allocation5 + $0x14] ss:$8 sps:$4 sm:$0xff]   ;;  %253 = vmatprep.mubr.bf16.mxu0 %v701_v21 }
  0x39   :  { %221 = vmatprep.subr.bf16.mxu0 %v548_v2  ;;  %v553_v13 = vld [vmem:[#allocation5 + $0x10] ss:$8 sps:$4 sm:$0xff]   ;;  %v554_v14 = vld [vmem:[#allocation5 + $0x24] ss:$8 sps:$4 sm:$0xff]   ;;  %v556_v15 = vld [vmem:[#allocation5 + $0x20] ss:$8 sps:$4 sm:$0xff]  }
  0x3a   :  { %222 = vmatpush1.bf16.msra.mxu0 %v550_v3  ;;  %v557_v16 = vld [vmem:[#allocation5 + $0x34] ss:$8 sps:$4 sm:$0xff]   ;;  %v559_v17 = vld [vmem:[#allocation5 + $0x30] ss:$8 sps:$4 sm:$0xff]   ;;  %v560_v18 = vld [vmem:[#allocation5 + $0x44] ss:$8 sps:$4 sm:$0xff]  }
  0x3b   :  { %223 = vmatprep.subr.bf16.mxu0 %v551_v4  ;;  %v562_v19 = vld [vmem:[#allocation5 + $0x40] ss:$8 sps:$4 sm:$0xff]   ;;  %v563_v20 = vld [vmem:[#allocation5 + $0x54] ss:$8 sps:$4 sm:$0xff]   ;;  %v565_v22 = vld [vmem:[#allocation5 + $0x50] ss:$8 sps:$4 sm:$0xff]  }
  0x3c   :  { %73 = vadd.xlane.f32.xlu0 %v70_v1  ;;  %v566_v23 = vld [vmem:[#allocation5 + $0x64] ss:$8 sps:$4 sm:$0xff]   ;;  %v568_v24 = vld [vmem:[#allocation5 + $0x60] ss:$8 sps:$4 sm:$0xff]   ;;  %v569_v25 = vld [vmem:[#allocation5 + $0x74] ss:$8 sps:$4 sm:$0xff]  }
  0x3d   :  { %v571_v26 = vld [vmem:[#allocation5 + $0x70] ss:$8 sps:$4 sm:$0xff]   ;;  %v572_v27 = vld [vmem:[#allocation7 + $0x40] sm:$0xff]   ;;  %v574_v29 = vld [vmem:[#allocation7 + $0x48] sm:$0xff]   ;;  %v132_v61 = vshrl.u32 %v131_v60, 7  ;;  %s469_s23 = sshll.u32 %s702_s22, 4  ;;  %s470_s23 = int_to_ptr.vmem [resolvable:$true] %s469_s23 }
  0x3e   :  { %224 = vmatpush1.bf16.msra.mxu0 %v553_v13  ;;  %v573_v28 = vld [vmem:[#allocation7] sm:$0xff]   ;;  %517 = vmatprep.subr.bf16.mxu1 %v572_v27  ;;  %v575_v30 = vld [vmem:[#allocation7 + $0x8] sm:$0xff]   ;;  %v482_v39 = vld [vmem:[%s820_s1] ss:$0 sm:$0xff]  ;;  %s666_s24 = scalar_lea.vmem %s470_s23, 256  ;;  %p671_p11 = scmp.lt.s32.totalorder %s470_s23, %s470_s23 }
  0x3f   :  { %225 = vmatprep.subr.bf16.mxu0 %v554_v14  ;;  %518 = vmatpush3.bf16.msra.mxu1 %v573_v28  ;;  %v483_v43 = vld [vmem:[%s821_s2] ss:$0 sm:$0xff]  ;;  %v578_v50 = vld [vmem:[#allocation7 + $0x58] sm:$0xff]   ;;  %v580_v52 = vld [vmem:[#allocation7 + $0x60] sm:$0xff]   ;;  %v133_v62 = vsub.s32 0, %v132_v61  ;;  %p667_p10 = scmp.ne.s32.totalorder %s470_s23, %s666_s24  ;;  %p672_p12 = scmp.lt.s32.totalorder %s666_s24, %s666_s24 }
  0x40   :  { %519 = vmatprep.subr.bf16.mxu1 %v574_v29  ;;  %v576_v48 = vld [vmem:[#allocation7 + $0x50] sm:$0xff]   ;;  %v579_v51 = vld [vmem:[#allocation7 + $0x18] sm:$0xff]   ;;  %v581_v53 = vld [vmem:[#allocation7 + $0x20] sm:$0xff]  }
  0x41   :  { %v577_v49 = vld [vmem:[#allocation7 + $0x10] sm:$0xff]   ;;  %v582_v54 = vld [vmem:[#allocation7 + $0x68] sm:$0xff]   ;;  %v586_v58 = vld [vmem:[#allocation7 + $0x78] sm:$0xff]   ;;  %p673_p13 = por %p672_p12, %p671_p11 }
  0x42   :  { %226 = vmatpush1.bf16.msra.mxu0 %v556_v15  ;;  %v583_v55 = vld [vmem:[#allocation7 + $0x28] sm:$0xff]   ;;  %v584_v56 = vld [vmem:[#allocation7 + $0x70] sm:$0xff]   ;;  %v587_v59 = vld [vmem:[#allocation7 + $0x38] sm:$0xff]  }
  0x43   :  { %227 = vmatprep.subr.bf16.mxu0 %v557_v16  ;;  %520 = vmatpush3.bf16.msra.mxu1 %v575_v30  ;;  %v585_v57 = vld [vmem:[#allocation7 + $0x30] sm:$0xff]   ;;  %p674_p0 = pnand %p673_p13, %p667_p10 }
  0x44   :  { %521 = vmatprep.subr.bf16.mxu1 %v576_v48  ;;  %v129_v63 = vld [vmem:[%s823_s4] sm:$0x3] }
  0x46   :  { %228 = vmatpush1.bf16.msra.mxu0 %v559_v17 }
  0x47   :  { %229 = vmatprep.subr.bf16.mxu0 %v560_v18  ;;  %522 = vmatpush3.bf16.msra.mxu1 %v577_v49 }
  0x48   :  { %523 = vmatprep.subr.bf16.mxu1 %v578_v50 }
  0x4a   :  { %230 = vmatpush1.bf16.msra.mxu0 %v562_v19 }
  0x4b   :  { %231 = vmatprep.subr.bf16.mxu0 %v563_v20  ;;  %524 = vmatpush3.bf16.msra.mxu1 %v579_v51 }
  0x4c   :  { %525 = vmatprep.subr.bf16.mxu1 %v580_v52 }
  0x4e   :  { %232 = vmatpush1.bf16.msra.mxu0 %v565_v22 }
  0x4f   :  { %233 = vmatprep.subr.bf16.mxu0 %v566_v23  ;;  %526 = vmatpush3.bf16.msra.mxu1 %v581_v53 }
  0x50   :  { %527 = vmatprep.subr.bf16.mxu1 %v582_v54 }
  0x52   :  { %234 = vmatpush1.bf16.msra.mxu0 %v568_v24 }
  0x53   :  { %235 = vmatprep.subr.bf16.mxu0 %v569_v25  ;;  %528 = vmatpush3.bf16.msra.mxu1 %v583_v55 }
  0x54   :  { %529 = vmatprep.subr.bf16.mxu1 %v584_v56 }
  0x56   :  { %236 = vmatpush1.bf16.msra.mxu0 %v571_v26 }
  0x57   :  { %530 = vmatpush3.bf16.msra.mxu1 %v585_v57 }
  0x58   :  { %531 = vmatprep.subr.bf16.mxu1 %v586_v58 }
  0x5b   :  { %532 = vmatpush3.bf16.msra.mxu1 %v587_v59 }
  0xc5   :  { %v72_v5 = vpop.xlane.xlu0 %71 }
  0xc6   :  { %v76_v6 = vmul.f32 0.0078125, %v72_v5 }
  0xc8   :  { %v78_v7 = vsub.f32 %v69_v0, %v76_v6  ;;  %v137_v0 = vsub.s32 1, %v132_v61 }
  0xc9   :  { %v74_v8 = vpop.xlane.xlu0 %73 }
  0xca   :  { %v77_v9 = vmul.f32 0.0078125, %v74_v8  ;;  %v80_v10 = vmul.f32 %v78_v7, %v78_v7  ;;  %v138_v2 = vrot.slane %v129_v63, %v137_v0 }
  0xcc   :  { %v79_v11 = vsub.f32 %v70_v1, %v77_v9  ;;  %82 = vadd.xlane.f32.xlu1 %v80_v10  ;;  %v134_v1 = vrot.slane %v129_v63, %v133_v62 }
  0xce   :  { %v81_v12 = vmul.f32 %v79_v11, %v79_v11 }
  0xd0   :  { %84 = vadd.xlane.f32.xlu1 %v81_v12 }
 0x159   :  { %v83_v31 = vpop.xlane.xlu1 %82 }
 0x15a   :  { %v86_v32 = vmul.f32 0.0078125, %v83_v31 }
 0x15c   :  { %v88_v33 = vadd.f32 1e-05, %v86_v32 }
 0x15d   :  { %v85_v34 = vpop.xlane.xlu1 %84 }
 0x15e   :  { %588 = vrsqrt.f32 %v88_v33  ;;  %v87_v35 = vmul.f32 0.0078125, %v85_v34  ;;  %v500_v34 = vld [vmem:[%s825_s6] ss:$0 sm:$0xff] }
 0x160   :  { %v89_v36 = vadd.f32 1e-05, %v87_v35 }
 0x162   :  { %590 = vrsqrt.f32 %v89_v36 }
 0x168   :  { %v589_v37 = vpop.eup %588 }
 0x169   :  { %v92_v38 = vmul.f32 %v589_v37, %v78_v7 }
 0x16b   :  { %v101_v42 = vmul.f32 %v482_v39, %v92_v38 }
 0x16c   :  { %v591_v40 = vpop.eup %590 }
 0x16d   :  { %v93_v41 = vmul.f32 %v591_v40, %v79_v11  ;;  %v110_v45 = vadd.f32 %v483_v43, %v101_v42 }
 0x16f   :  { %v102_v44 = vmul.f32 %v482_v39, %v93_v41 }
 0x171   :  { %v111_v46 = vadd.f32 %v483_v43, %v102_v44 }
 0x173   :  { %v112_v47 = vpack.c.bf16 %v111_v46, %v110_v45 }
 0x175   :  { %254 = vmatmul.mubr.bf16.vlgmr.msra.gmra.mrb[0].mxu0 %v112_v47 }
 0x248   :  { %v255_v3 = vpop.f32.mrb[0].mxu0 }
 0x249   :  { %v256_v4 = vadd.f32 %v255_v3, %v134_v1  ;;  %v257_v5 = vpop.f32.mrb[1].mxu0 }
 0x24a   :  { %v258_v6 = vadd.f32 %v257_v5, %v138_v2  ;;  %v259_v7 = vpop.f32.mrb[2].mxu0 }
 0x24b   :  { %v268_v8 = vmul.f32 0.70710677, %v256_v4  ;;  %v260_v9 = vadd.f32 %v259_v7, %v134_v1  ;;  %v261_v10 = vpop.f32.mrb[3].mxu0  ;;  %v264_v21 = vmul.f32 0.5, %v256_v4 }
 0x24c   :  { %v269_v11 = vmul.f32 0.70710677, %v258_v6  ;;  %v262_v12 = vadd.f32 %v261_v10, %v138_v2  ;;  %v265_v24 = vmul.f32 0.5, %v258_v6 }
 0x24d   :  { %592 = verf.f32 %v268_v8  ;;  %v270_v13 = vmul.f32 0.70710677, %v260_v9  ;;  %v266_v22 = vmul.f32 0.5, %v260_v9 }
 0x24e   :  { %594 = verf.f32 %v269_v11  ;;  %v271_v14 = vmul.f32 0.70710677, %v262_v12  ;;  %v267_v25 = vmul.f32 0.5, %v262_v12 }
 0x24f   :  { %596 = verf.f32 %v270_v13 }
 0x250   :  { %598 = verf.f32 %v271_v14 }
 0x257   :  { %v593_v15 = vpop.eup %592 }
 0x258   :  { %v595_v16 = vpop.eup %594  ;;  %v276_v17 = vadd.f32 1.0, %v593_v15 }
 0x259   :  { %v597_v18 = vpop.eup %596  ;;  %v277_v19 = vadd.f32 1.0, %v595_v16 }
 0x25a   :  { %v599_v20 = vpop.eup %598  ;;  %v278_v23 = vadd.f32 1.0, %v597_v18  ;;  %v280_v27 = vmul.f32 %v276_v17, %v264_v21 }
 0x25b   :  { %v279_v26 = vadd.f32 1.0, %v599_v20  ;;  %v281_v29 = vmul.f32 %v277_v19, %v265_v24 }
 0x25c   :  { %v282_v28 = vmul.f32 %v278_v23, %v266_v22 }
 0x25d   :  { %v283_v30 = vmul.f32 %v279_v26, %v267_v25 }
 0x25e   :  { %v284_v31 = vpack.c.bf16 %v282_v28, %v280_v27 }
 0x25f   :  { %v285_v32 = vpack.c.bf16 %v283_v30, %v281_v29 }
 0x261   :  { %453 = vmatprep.mubr.bf16.mxu1 %v285_v32 }
 0x262   :  { %454 = vmatmul.mubr.bf16.vlgmr.msra.gmra.mrb[0].mxu1 %v284_v31 }
 0x335   :  { %v533_v33 = vpop.f32.mrb[0].mxu1 }
 0x336   :  { %v534_v35 = vpop.f32.mrb[1].mxu1 }
 0x337   :  { %v535_v36 = vadd.f32 %v534_v35, %v533_v33  ;;  %v536_v37 = vpop.f32.mrb[2].mxu1 }
 0x338   :  { %v537_v38 = vpop.f32.mrb[3].mxu1 }
 0x339   :  { %v456_v39 = vadd.f32 %v535_v36, %v500_v34  ;;  %v538_v40 = vadd.f32 %v537_v38, %v536_v37 }
 0x33b   :  { %462 = vst [vmem:[#allocation8] sm:$0xff] %v456_v39  ;;  %v459_v41 = vadd.f32 %v538_v40, %v500_v34 }
 0x33d   :  { %463 = vst [vmem:[#allocation8 + $0x8] sm:$0xff] %v459_v41 }
 0x33e   :  { %677 = shalt.err (!%p674_p0)
}
 0x33f   :  { %s678_s25 = scalar_lea.hbm %s826_s7, 256 }
 0x340   :  { %p679_p1 = scmp.ne.s32.totalorder %s826_s7, %s678_s25  ;;  %p682_p2 = scmp.lt.u32.totalorder %s678_s25, %s826_s7 }
 0x342   :  { %p684_p3 = pnand %p682_p2, %p679_p1 }
 0x344   :  { %687 = shalt.err (!%p684_p3)
}
 0x345   :  { %475 = dma.vmem_to_hbm [thread:$0]  %s470_s23, 256, %s826_s7, [#allocation4], %s696_s13, %s696_s13, %s697_s14  }
 0x346   :  { %692 = dma.done.wait [#allocation4], 256  }
 0x347   :  { %693 = vsyncadd [#allocation4], 4294967040 }
 0x348   :  { %479 = vsyncpa [#allocation3], 1 }
 0x349   :  { %480 = vsyncpa [#allocation6], 1 }
 0x34a   :  { %481 = vsyncpa [#allocation4], 1 }

</bundles_post_ra>
